<compile_context>
chip_gen: v5e
topology: v5e:2x2
jax: 0.10.0
libtpu: 0.0.40
codegen_flags: <defaults>
</compile_context>

<pallas_src>
import functools

import jax
import jax.numpy as jnp
from jax import lax
from jax.experimental import pallas as pl
from jax.experimental.pallas import tpu as pltpu


def _round_up(x, m):
    return ((x + m - 1) // m) * m


def _cdiv(a, b):
    return (a + b - 1) // b


def _is_v7x():
    """Best-effort detection of a 2-TensorCore (v7x) chip."""
    try:
        return "v7" in jax.devices()[0].device_kind.lower()
    except Exception:
        return False


def _choose_tiling(B, S, H):
    """Pick (b_tile, num_b_shards, t_chunk, S_pad, B_pad)."""
    H4 = 4 * H
    # Time chunk: amortize the ~0.35us/grid-step pipeline overhead; the tail
    # is padded and masked in-kernel, so S needs no nice divisor.
    t_chunk = max(1, min(64, S))
    # Batch shards: whole batch per grid step; 2 shards on v7x so both
    # TensorCores get work along the "parallel" axis.
    num_shards = 2 if (_is_v7x() and B >= 16) else 1
    num_shards = min(num_shards, max(1, _cdiv(B, 8)))

    # Keep the double-buffered f32 x_proj slab well under the default scoped
    # VMEM limit of every generation (16 MiB on v5e, 32 MiB on v6e/v7x).
    slab_budget = 12 * 1024 * 1024

    def slab_bytes(bt, tc):
        return 2 * tc * bt * H4 * 4  # f32, double buffered

    b_tile = _round_up(_cdiv(B, num_shards), 8)
    while slab_bytes(b_tile, t_chunk) > slab_budget and num_shards < _cdiv(B, 8):
        num_shards *= 2
        b_tile = _round_up(_cdiv(B, num_shards), 8)
    while slab_bytes(b_tile, t_chunk) > slab_budget and t_chunk > 8:
        t_chunk = max(8, t_chunk // 2)

    S_pad = _round_up(S, t_chunk)
    B_pad = b_tile * num_shards
    return b_tile, num_shards, t_chunk, S_pad, B_pad


def lstm_recurrence_kernel(xp_ref, whh_ref, hout_ref, h_sc, c_sc, *,
                           seq_len, time_padded, unroll):
    """One batch shard x one time chunk of the serial LSTM recurrence.

    xp_ref:  (T_chunk, B_tile, 4H) f32  pre-activations x@W_ih^T + b_ih + b_hh
    whh_ref: (H, 4H)               bf16 recurrent weight, pre-transposed
    hout_ref:(B_tile, H)           f32  final hidden state h_n for this shard
    h_sc/c_sc: (B_tile, H) f32 VMEM scratch, persistent across time chunks
    """
    tc = pl.program_id(1)
    t_chunk = xp_ref.shape[0]
    H = h_sc.shape[1]

    @pl.when(tc == 0)
    def _():
        h_sc[...] = jnp.zeros_like(h_sc)
        c_sc[...] = jnp.zeros_like(c_sc)

    whh = whh_ref[...]                    # resident (H, 4H) bf16
    base_t = tc * t_chunk

    def step(t, carry):
        h, c = carry
        # (B_tile, 4H) gate pre-activations; bf16 MXU operands, f32 accumulate.
        gates = xp_ref[t] + jnp.dot(h.astype(jnp.bfloat16), whh,
                                    preferred_element_type=jnp.float32)
        # Full-tile activations: 2 EUP pushes cover all four gates (PyTorch
        # order [i, f, g, o]).  The H-wide views below are lane realignments
        # (XLU slot), off the EUP critical path.
        sig = jax.nn.sigmoid(gates)
        tnh = jnp.tanh(gates)
        i_g = sig[:, 0 * H:1 * H]
        f_g = sig[:, 1 * H:2 * H]
        g_g = tnh[:, 2 * H:3 * H]
        o_g = sig[:, 3 * H:4 * H]
        c_new = f_g * c + i_g * g_g
        h_new = o_g * jnp.tanh(c_new)
        if time_padded:
            # Tail steps past the real sequence length are no-ops.
            valid = (base_t + t) < seq_len
            h_new = jnp.where(valid, h_new, h)
            c_new = jnp.where(valid, c_new, c)
        return h_new, c_new

    h, c = lax.fori_loop(0, t_chunk, step, (h_sc[...], c_sc[...]),
                         unroll=unroll)
    h_sc[...] = h
    c_sc[...] = c

    @pl.when(tc == pl.num_programs(1) - 1)
    def _():
        hout_ref[...] = h.astype(hout_ref.dtype)


@functools.partial(jax.jit, static_argnames=("hidden_dim", "num_label"))
def lstm_classifier_forward(x_ids, emb_table, w_ih, w_hh, b_ih, b_hh,
                            w_cls, b_cls, *, hidden_dim, num_label):
    """x_ids: (B, S) int32 token ids.  Returns (B, num_label) float32."""
    B, S = x_ids.shape
    H = hidden_dim
    H4 = 4 * H

    # ---- Glue (plain XLA): embedding gather + hoisted input projection ----
    # The time-independent x @ W_ih^T + (b_ih + b_hh) is ONE batched matmul,
    # emitted directly in (S, B, 4H) layout.
    x_vec = jnp.take(emb_table, x_ids, axis=0)               # (B, S, E)
    bias = (b_ih + b_hh).astype(jnp.float32)                  # (4H,)
    x_proj = jnp.einsum("bse,ge->sbg", x_vec.astype(jnp.float32),
                        w_ih.astype(jnp.float32),
                        preferred_element_type=jnp.float32) + bias   # (S,B,4H)

    # ---- Tiling: whole batch per grid step, coarse time chunks ----
    b_tile, num_shards, t_chunk, S_pad, B_pad = _choose_tiling(B, S, H)
    num_chunks = S_pad // t_chunk
    time_padded = (S_pad != S)

    if (S_pad != S) or (B_pad != B):
        x_proj = jnp.pad(x_proj, ((0, S_pad - S), (0, B_pad - B), (0, 0)))

    whh_t = w_hh.T.astype(jnp.bfloat16)                       # (H, 4H) bf16

    kernel = functools.partial(lstm_recurrence_kernel,
                               seq_len=S,
                               time_padded=time_padded,
                               unroll=min(8, t_chunk))

    grid_spec = pltpu.PrefetchScalarGridSpec(
        num_scalar_prefetch=0,
        grid=(num_shards, num_chunks),
        in_specs=[
            # (T_chunk, B_tile, 4H) pre-activation slab, double-buffered.
            pl.BlockSpec((t_chunk, b_tile, H4), lambda b, t: (t, b, 0)),
            # Recurrent weight: constant index_map -> fetched once, resident.
            pl.BlockSpec((H, H4), lambda b, t: (0, 0)),
        ],
        out_specs=pl.BlockSpec((b_tile, H), lambda b, t: (b, 0)),
        scratch_shapes=[
            pltpu.VMEM((b_tile, H), jnp.float32),   # h state
            pltpu.VMEM((b_tile, H), jnp.float32),   # c state
        ],
    )

    h_n = pl.pallas_call(
        kernel,
        out_shape=jax.ShapeDtypeStruct((B_pad, H), jnp.float32),
        grid_spec=grid_spec,
        compiler_params=pltpu.CompilerParams(
            # batch shards are independent (v7x megacore); time is serial.
            dimension_semantics=("parallel", "arbitrary")),
    )(x_proj, whh_t)

    # ---- Tiny H -> L classifier in the wrapper (XLA fuses it) ----
    h_n = h_n[:B]                                              # (B, H)
    logits = h_n @ w_cls.T.astype(jnp.float32) + b_cls.astype(jnp.float32)
    return logits


def reference_forward(x_ids, emb_table, w_ih, w_hh, b_ih, b_hh, w_cls, b_cls,
                      hidden_dim):
    """Pure-JAX reference matching PyTorch LSTM semantics."""
    x_vec = jnp.take(emb_table, x_ids, axis=0)   # (B, S, E)
    B, S, _ = x_vec.shape
    h = jnp.zeros((B, hidden_dim), jnp.float32)
    c = jnp.zeros((B, hidden_dim), jnp.float32)
    H = hidden_dim
    for t in range(S):
        x_t = x_vec[:, t, :]
        gates = x_t @ w_ih.T + h @ w_hh.T + b_ih + b_hh
        i_g = jax.nn.sigmoid(gates[:, 0 * H:1 * H])
        f_g = jax.nn.sigmoid(gates[:, 1 * H:2 * H])
        g_g = jnp.tanh(gates[:, 2 * H:3 * H])
        o_g = jax.nn.sigmoid(gates[:, 3 * H:4 * H])
        c = f_g * c + i_g * g_g
        h = o_g * jnp.tanh(c)
    return h @ w_cls.T + b_cls


if __name__ == "__main__":
    # Small, deterministic configuration.
    VOCAB = 50
    EMBED = 300          # fixed by nn.LSTM(300, hidden_dim)
    HIDDEN = 32
    NUM_LABEL = 5
    BATCH = 2
    SEQ = 8

    key = jax.random.PRNGKey(0)
    k_emb, k_ids, k_wih, k_whh, k_bih, k_bhh, k_wc, k_bc = jax.random.split(key, 8)

    emb_table = jax.random.normal(k_emb, (VOCAB, EMBED), jnp.float32)
    x_ids = jax.random.randint(k_ids, (BATCH, SEQ), 0, VOCAB, jnp.int32)

    scale = 1.0 / jnp.sqrt(HIDDEN)
    w_ih = jax.random.uniform(k_wih, (4 * HIDDEN, EMBED), jnp.float32, -scale, scale)
    w_hh = jax.random.uniform(k_whh, (4 * HIDDEN, HIDDEN), jnp.float32, -scale, scale)
    b_ih = jax.random.uniform(k_bih, (4 * HIDDEN,), jnp.float32, -scale, scale)
    b_hh = jax.random.uniform(k_bhh, (4 * HIDDEN,), jnp.float32, -scale, scale)
    w_cls = jax.random.uniform(k_wc, (NUM_LABEL, HIDDEN), jnp.float32, -scale, scale)
    b_cls = jax.random.uniform(k_bc, (NUM_LABEL,), jnp.float32, -scale, scale)

    out = lstm_classifier_forward(
        x_ids, emb_table, w_ih, w_hh, b_ih, b_hh, w_cls, b_cls,
        hidden_dim=HIDDEN, num_label=NUM_LABEL)
    out = jax.block_until_ready(out)

    ref = reference_forward(x_ids, emb_table, w_ih, w_hh, b_ih, b_hh,
                            w_cls, b_cls, HIDDEN)
    assert out.shape == (BATCH, NUM_LABEL)
    # Tolerance reflects bf16 MXU operands on the recurrent matmul (the same
    # rounding XLA's default precision applies to the pure-JAX reference).
    assert jnp.allclose(out, ref, atol=2e-4, rtol=2e-4), (out, ref)

    print("KERNEL_OK")
</pallas_src>

<mosaic_0001>
module attributes {stable_mosaic.version = 11 : i64} {
  func.func @lstm_recurrence_kernel(%arg0: i32, %arg1: i32, %arg2: memref<8x8x128xf32, #tpu.memory_space<vmem>>, %arg3: memref<32x128xbf16, #tpu.memory_space<vmem>>, %arg4: memref<8x32xf32, #tpu.memory_space<vmem>>, %arg5: memref<8x32xf32, #tpu.memory_space<vmem>>, %arg6: memref<8x32xf32, #tpu.memory_space<vmem>>) attributes {dimension_semantics = [#tpu.dimension_semantics<parallel>, #tpu.dimension_semantics<arbitrary>], iteration_bounds = array<i64: 1, 1>, scalar_prefetch = 0 : i64, scratch_operands = 2 : i64, tpu.core_type = #tpu.core_type<tc>, window_params = [{transform_indices = @transform_0, window_bounds = array<i64: 8, 8, 128>}, {pipeline_mode = #tpu.pipeline_mode<synchronous>, transform_indices = @transform_1, window_bounds = array<i64: 32, 128>}, {transform_indices = @transform_2, window_bounds = array<i64: 8, 32>}]} {
    %c0_i32 = arith.constant 0 : i32
    %0 = arith.cmpi eq, %arg1, %c0_i32 : i32
    %1 = arith.extui %0 : i1 to i32
    %c0_i32_0 = arith.constant 0 : i32
    %2 = arith.cmpi ne, %1, %c0_i32_0 : i32
    scf.if %2 {
      %cst_44 = arith.constant 0.000000e+00 : f32
      %179 = vector.broadcast %cst_44 : f32 to vector<8x32xf32>
      %c0_45 = arith.constant 0 : index
      %c0_46 = arith.constant 0 : index
      %180 = vector.load %arg5[%c0_45, %c0_46] : memref<8x32xf32, #tpu.memory_space<vmem>>, vector<8x32xf32>
      tpu.vector_store %arg5[%c0_45, %c0_46], %179 {strides = array<i32>} : memref<8x32xf32, #tpu.memory_space<vmem>>, vector<8x32xf32>,
      %cst_47 = arith.constant 0.000000e+00 : f32
      %181 = vector.broadcast %cst_47 : f32 to vector<8x32xf32>
      %c0_48 = arith.constant 0 : index
      %c0_49 = arith.constant 0 : index
      %182 = vector.load %arg6[%c0_48, %c0_49] : memref<8x32xf32, #tpu.memory_space<vmem>>, vector<8x32xf32>
      tpu.vector_store %arg6[%c0_48, %c0_49], %181 {strides = array<i32>} : memref<8x32xf32, #tpu.memory_space<vmem>>, vector<8x32xf32>,
    } else {
    }
    %c0 = arith.constant 0 : index
    %c0_1 = arith.constant 0 : index
    %3 = vector.load %arg3[%c0, %c0_1] : memref<32x128xbf16, #tpu.memory_space<vmem>>, vector<32x128xbf16>
    %c0_2 = arith.constant 0 : index
    %c0_3 = arith.constant 0 : index
    %4 = vector.load %arg5[%c0_2, %c0_3] : memref<8x32xf32, #tpu.memory_space<vmem>>, vector<8x32xf32>
    %c0_4 = arith.constant 0 : index
    %c0_5 = arith.constant 0 : index
    %5 = vector.load %arg6[%c0_4, %c0_5] : memref<8x32xf32, #tpu.memory_space<vmem>>, vector<8x32xf32>
    %c0_i32_6 = arith.constant 0 : i32
    %6 = arith.index_cast %c0_i32_6 : i32 to index
    %c0_7 = arith.constant 0 : index
    %c0_8 = arith.constant 0 : index
    %7 = vector.load %arg2[%6, %c0_7, %c0_8] : memref<8x8x128xf32, #tpu.memory_space<vmem>>, vector<1x8x128xf32>
    %8 = vector.shape_cast %7 : vector<1x8x128xf32> to vector<8x128xf32>
    %9 = arith.truncf %4 : vector<8x32xf32> to vector<8x32xbf16>
    %cst = arith.constant dense<0.000000e+00> : vector<8x128xf32>
    %10 = tpu.matmul %9, %3, %cst {dimension_numbers = #tpu.dot_dimension_numbers<[1], [0], [0], [1], [0, 0, 1, 1], [], []>} : vector<8x32xbf16>, vector<32x128xbf16>, vector<8x128xf32> -> vector<8x128xf32>
    %11 = arith.addf %8, %10 : vector<8x128xf32>
    %12 = arith.negf %11 : vector<8x128xf32>
    %13 = math.exp %12 : vector<8x128xf32>
    %cst_9 = arith.constant 1.000000e+00 : f32
    %14 = vector.broadcast %cst_9 : f32 to vector<8x128xf32>
    %15 = arith.addf %14, %13 : vector<8x128xf32>
    %16 = arith.divf %14, %15 : vector<8x128xf32>
    %17 = math.tanh %11 : vector<8x128xf32>
    %18 = vector.extract_strided_slice %16 {offsets = [0, 0], sizes = [8, 32], strides = [1, 1]} : vector<8x128xf32> to vector<8x32xf32>
    %19 = vector.extract_strided_slice %16 {offsets = [0, 32], sizes = [8, 32], strides = [1, 1]} : vector<8x128xf32> to vector<8x32xf32>
    %20 = vector.extract_strided_slice %17 {offsets = [0, 64], sizes = [8, 32], strides = [1, 1]} : vector<8x128xf32> to vector<8x32xf32>
    %21 = vector.extract_strided_slice %16 {offsets = [0, 96], sizes = [8, 32], strides = [1, 1]} : vector<8x128xf32> to vector<8x32xf32>
    %22 = arith.mulf %19, %5 : vector<8x32xf32>
    %23 = arith.mulf %18, %20 : vector<8x32xf32>
    %24 = arith.addf %22, %23 : vector<8x32xf32>
    %25 = math.tanh %24 : vector<8x32xf32>
    %26 = arith.mulf %21, %25 : vector<8x32xf32>
    %c1_i32 = arith.constant 1 : i32
    %27 = arith.index_cast %c1_i32 : i32 to index
    %c0_10 = arith.constant 0 : index
    %c0_11 = arith.constant 0 : index
    %28 = vector.load %arg2[%27, %c0_10, %c0_11] : memref<8x8x128xf32, #tpu.memory_space<vmem>>, vector<1x8x128xf32>
    %29 = vector.shape_cast %28 : vector<1x8x128xf32> to vector<8x128xf32>
    %30 = arith.truncf %26 : vector<8x32xf32> to vector<8x32xbf16>
    %cst_12 = arith.constant dense<0.000000e+00> : vector<8x128xf32>
    %31 = tpu.matmul %30, %3, %cst_12 {dimension_numbers = #tpu.dot_dimension_numbers<[1], [0], [0], [1], [0, 0, 1, 1], [], []>} : vector<8x32xbf16>, vector<32x128xbf16>, vector<8x128xf32> -> vector<8x128xf32>
    %32 = arith.addf %29, %31 : vector<8x128xf32>
    %33 = arith.negf %32 : vector<8x128xf32>
    %34 = math.exp %33 : vector<8x128xf32>
    %cst_13 = arith.constant 1.000000e+00 : f32
    %35 = vector.broadcast %cst_13 : f32 to vector<8x128xf32>
    %36 = arith.addf %35, %34 : vector<8x128xf32>
    %37 = arith.divf %35, %36 : vector<8x128xf32>
    %38 = math.tanh %32 : vector<8x128xf32>
    %39 = vector.extract_strided_slice %37 {offsets = [0, 0], sizes = [8, 32], strides = [1, 1]} : vector<8x128xf32> to vector<8x32xf32>
    %40 = vector.extract_strided_slice %37 {offsets = [0, 32], sizes = [8, 32], strides = [1, 1]} : vector<8x128xf32> to vector<8x32xf32>
    %41 = vector.extract_strided_slice %38 {offsets = [0, 64], sizes = [8, 32], strides = [1, 1]} : vector<8x128xf32> to vector<8x32xf32>
    %42 = vector.extract_strided_slice %37 {offsets = [0, 96], sizes = [8, 32], strides = [1, 1]} : vector<8x128xf32> to vector<8x32xf32>
    %43 = arith.mulf %40, %24 : vector<8x32xf32>
    %44 = arith.mulf %39, %41 : vector<8x32xf32>
    %45 = arith.addf %43, %44 : vector<8x32xf32>
    %46 = math.tanh %45 : vector<8x32xf32>
    %47 = arith.mulf %42, %46 : vector<8x32xf32>
    %c2_i32 = arith.constant 2 : i32
    %48 = arith.index_cast %c2_i32 : i32 to index
    %c0_14 = arith.constant 0 : index
    %c0_15 = arith.constant 0 : index
    %49 = vector.load %arg2[%48, %c0_14, %c0_15] : memref<8x8x128xf32, #tpu.memory_space<vmem>>, vector<1x8x128xf32>
    %50 = vector.shape_cast %49 : vector<1x8x128xf32> to vector<8x128xf32>
    %51 = arith.truncf %47 : vector<8x32xf32> to vector<8x32xbf16>
    %cst_16 = arith.constant dense<0.000000e+00> : vector<8x128xf32>
    %52 = tpu.matmul %51, %3, %cst_16 {dimension_numbers = #tpu.dot_dimension_numbers<[1], [0], [0], [1], [0, 0, 1, 1], [], []>} : vector<8x32xbf16>, vector<32x128xbf16>, vector<8x128xf32> -> vector<8x128xf32>
    %53 = arith.addf %50, %52 : vector<8x128xf32>
    %54 = arith.negf %53 : vector<8x128xf32>
    %55 = math.exp %54 : vector<8x128xf32>
    %cst_17 = arith.constant 1.000000e+00 : f32
    %56 = vector.broadcast %cst_17 : f32 to vector<8x128xf32>
    %57 = arith.addf %56, %55 : vector<8x128xf32>
    %58 = arith.divf %56, %57 : vector<8x128xf32>
    %59 = math.tanh %53 : vector<8x128xf32>
    %60 = vector.extract_strided_slice %58 {offsets = [0, 0], sizes = [8, 32], strides = [1, 1]} : vector<8x128xf32> to vector<8x32xf32>
    %61 = vector.extract_strided_slice %58 {offsets = [0, 32], sizes = [8, 32], strides = [1, 1]} : vector<8x128xf32> to vector<8x32xf32>
    %62 = vector.extract_strided_slice %59 {offsets = [0, 64], sizes = [8, 32], strides = [1, 1]} : vector<8x128xf32> to vector<8x32xf32>
    %63 = vector.extract_strided_slice %58 {offsets = [0, 96], sizes = [8, 32], strides = [1, 1]} : vector<8x128xf32> to vector<8x32xf32>
    %64 = arith.mulf %61, %45 : vector<8x32xf32>
    %65 = arith.mulf %60, %62 : vector<8x32xf32>
    %66 = arith.addf %64, %65 : vector<8x32xf32>
    %67 = math.tanh %66 : vector<8x32xf32>
    %68 = arith.mulf %63, %67 : vector<8x32xf32>
    %c3_i32 = arith.constant 3 : i32
    %69 = arith.index_cast %c3_i32 : i32 to index
    %c0_18 = arith.constant 0 : index
    %c0_19 = arith.constant 0 : index
    %70 = vector.load %arg2[%69, %c0_18, %c0_19] : memref<8x8x128xf32, #tpu.memory_space<vmem>>, vector<1x8x128xf32>
    %71 = vector.shape_cast %70 : vector<1x8x128xf32> to vector<8x128xf32>
    %72 = arith.truncf %68 : vector<8x32xf32> to vector<8x32xbf16>
    %cst_20 = arith.constant dense<0.000000e+00> : vector<8x128xf32>
    %73 = tpu.matmul %72, %3, %cst_20 {dimension_numbers = #tpu.dot_dimension_numbers<[1], [0], [0], [1], [0, 0, 1, 1], [], []>} : vector<8x32xbf16>, vector<32x128xbf16>, vector<8x128xf32> -> vector<8x128xf32>
    %74 = arith.addf %71, %73 : vector<8x128xf32>
    %75 = arith.negf %74 : vector<8x128xf32>
    %76 = math.exp %75 : vector<8x128xf32>
    %cst_21 = arith.constant 1.000000e+00 : f32
    %77 = vector.broadcast %cst_21 : f32 to vector<8x128xf32>
    %78 = arith.addf %77, %76 : vector<8x128xf32>
    %79 = arith.divf %77, %78 : vector<8x128xf32>
    %80 = math.tanh %74 : vector<8x128xf32>
    %81 = vector.extract_strided_slice %79 {offsets = [0, 0], sizes = [8, 32], strides = [1, 1]} : vector<8x128xf32> to vector<8x32xf32>
    %82 = vector.extract_strided_slice %79 {offsets = [0, 32], sizes = [8, 32], strides = [1, 1]} : vector<8x128xf32> to vector<8x32xf32>
    %83 = vector.extract_strided_slice %80 {offsets = [0, 64], sizes = [8, 32], strides = [1, 1]} : vector<8x128xf32> to vector<8x32xf32>
    %84 = vector.extract_strided_slice %79 {offsets = [0, 96], sizes = [8, 32], strides = [1, 1]} : vector<8x128xf32> to vector<8x32xf32>
    %85 = arith.mulf %82, %66 : vector<8x32xf32>
    %86 = arith.mulf %81, %83 : vector<8x32xf32>
    %87 = arith.addf %85, %86 : vector<8x32xf32>
    %88 = math.tanh %87 : vector<8x32xf32>
    %89 = arith.mulf %84, %88 : vector<8x32xf32>
    %c4_i32 = arith.constant 4 : i32
    %90 = arith.index_cast %c4_i32 : i32 to index
    %c0_22 = arith.constant 0 : index
    %c0_23 = arith.constant 0 : index
    %91 = vector.load %arg2[%90, %c0_22, %c0_23] : memref<8x8x128xf32, #tpu.memory_space<vmem>>, vector<1x8x128xf32>
    %92 = vector.shape_cast %91 : vector<1x8x128xf32> to vector<8x128xf32>
    %93 = arith.truncf %89 : vector<8x32xf32> to vector<8x32xbf16>
    %cst_24 = arith.constant dense<0.000000e+00> : vector<8x128xf32>
    %94 = tpu.matmul %93, %3, %cst_24 {dimension_numbers = #tpu.dot_dimension_numbers<[1], [0], [0], [1], [0, 0, 1, 1], [], []>} : vector<8x32xbf16>, vector<32x128xbf16>, vector<8x128xf32> -> vector<8x128xf32>
    %95 = arith.addf %92, %94 : vector<8x128xf32>
    %96 = arith.negf %95 : vector<8x128xf32>
    %97 = math.exp %96 : vector<8x128xf32>
    %cst_25 = arith.constant 1.000000e+00 : f32
    %98 = vector.broadcast %cst_25 : f32 to vector<8x128xf32>
    %99 = arith.addf %98, %97 : vector<8x128xf32>
    %100 = arith.divf %98, %99 : vector<8x128xf32>
    %101 = math.tanh %95 : vector<8x128xf32>
    %102 = vector.extract_strided_slice %100 {offsets = [0, 0], sizes = [8, 32], strides = [1, 1]} : vector<8x128xf32> to vector<8x32xf32>
    %103 = vector.extract_strided_slice %100 {offsets = [0, 32], sizes = [8, 32], strides = [1, 1]} : vector<8x128xf32> to vector<8x32xf32>
    %104 = vector.extract_strided_slice %101 {offsets = [0, 64], sizes = [8, 32], strides = [1, 1]} : vector<8x128xf32> to vector<8x32xf32>
    %105 = vector.extract_strided_slice %100 {offsets = [0, 96], sizes = [8, 32], strides = [1, 1]} : vector<8x128xf32> to vector<8x32xf32>
    %106 = arith.mulf %103, %87 : vector<8x32xf32>
    %107 = arith.mulf %102, %104 : vector<8x32xf32>
    %108 = arith.addf %106, %107 : vector<8x32xf32>
    %109 = math.tanh %108 : vector<8x32xf32>
    %110 = arith.mulf %105, %109 : vector<8x32xf32>
    %c5_i32 = arith.constant 5 : i32
    %111 = arith.index_cast %c5_i32 : i32 to index
    %c0_26 = arith.constant 0 : index
    %c0_27 = arith.constant 0 : index
    %112 = vector.load %arg2[%111, %c0_26, %c0_27] : memref<8x8x128xf32, #tpu.memory_space<vmem>>, vector<1x8x128xf32>
    %113 = vector.shape_cast %112 : vector<1x8x128xf32> to vector<8x128xf32>
    %114 = arith.truncf %110 : vector<8x32xf32> to vector<8x32xbf16>
    %cst_28 = arith.constant dense<0.000000e+00> : vector<8x128xf32>
    %115 = tpu.matmul %114, %3, %cst_28 {dimension_numbers = #tpu.dot_dimension_numbers<[1], [0], [0], [1], [0, 0, 1, 1], [], []>} : vector<8x32xbf16>, vector<32x128xbf16>, vector<8x128xf32> -> vector<8x128xf32>
    %116 = arith.addf %113, %115 : vector<8x128xf32>
    %117 = arith.negf %116 : vector<8x128xf32>
    %118 = math.exp %117 : vector<8x128xf32>
    %cst_29 = arith.constant 1.000000e+00 : f32
    %119 = vector.broadcast %cst_29 : f32 to vector<8x128xf32>
    %120 = arith.addf %119, %118 : vector<8x128xf32>
    %121 = arith.divf %119, %120 : vector<8x128xf32>
    %122 = math.tanh %116 : vector<8x128xf32>
    %123 = vector.extract_strided_slice %121 {offsets = [0, 0], sizes = [8, 32], strides = [1, 1]} : vector<8x128xf32> to vector<8x32xf32>
    %124 = vector.extract_strided_slice %121 {offsets = [0, 32], sizes = [8, 32], strides = [1, 1]} : vector<8x128xf32> to vector<8x32xf32>
    %125 = vector.extract_strided_slice %122 {offsets = [0, 64], sizes = [8, 32], strides = [1, 1]} : vector<8x128xf32> to vector<8x32xf32>
    %126 = vector.extract_strided_slice %121 {offsets = [0, 96], sizes = [8, 32], strides = [1, 1]} : vector<8x128xf32> to vector<8x32xf32>
    %127 = arith.mulf %124, %108 : vector<8x32xf32>
    %128 = arith.mulf %123, %125 : vector<8x32xf32>
    %129 = arith.addf %127, %128 : vector<8x32xf32>
    %130 = math.tanh %129 : vector<8x32xf32>
    %131 = arith.mulf %126, %130 : vector<8x32xf32>
    %c6_i32 = arith.constant 6 : i32
    %132 = arith.index_cast %c6_i32 : i32 to index
    %c0_30 = arith.constant 0 : index
    %c0_31 = arith.constant 0 : index
    %133 = vector.load %arg2[%132, %c0_30, %c0_31] : memref<8x8x128xf32, #tpu.memory_space<vmem>>, vector<1x8x128xf32>
    %134 = vector.shape_cast %133 : vector<1x8x128xf32> to vector<8x128xf32>
    %135 = arith.truncf %131 : vector<8x32xf32> to vector<8x32xbf16>
    %cst_32 = arith.constant dense<0.000000e+00> : vector<8x128xf32>
    %136 = tpu.matmul %135, %3, %cst_32 {dimension_numbers = #tpu.dot_dimension_numbers<[1], [0], [0], [1], [0, 0, 1, 1], [], []>} : vector<8x32xbf16>, vector<32x128xbf16>, vector<8x128xf32> -> vector<8x128xf32>
    %137 = arith.addf %134, %136 : vector<8x128xf32>
    %138 = arith.negf %137 : vector<8x128xf32>
    %139 = math.exp %138 : vector<8x128xf32>
    %cst_33 = arith.constant 1.000000e+00 : f32
    %140 = vector.broadcast %cst_33 : f32 to vector<8x128xf32>
    %141 = arith.addf %140, %139 : vector<8x128xf32>
    %142 = arith.divf %140, %141 : vector<8x128xf32>
    %143 = math.tanh %137 : vector<8x128xf32>
    %144 = vector.extract_strided_slice %142 {offsets = [0, 0], sizes = [8, 32], strides = [1, 1]} : vector<8x128xf32> to vector<8x32xf32>
    %145 = vector.extract_strided_slice %142 {offsets = [0, 32], sizes = [8, 32], strides = [1, 1]} : vector<8x128xf32> to vector<8x32xf32>
    %146 = vector.extract_strided_slice %143 {offsets = [0, 64], sizes = [8, 32], strides = [1, 1]} : vector<8x128xf32> to vector<8x32xf32>
    %147 = vector.extract_strided_slice %142 {offsets = [0, 96], sizes = [8, 32], strides = [1, 1]} : vector<8x128xf32> to vector<8x32xf32>
    %148 = arith.mulf %145, %129 : vector<8x32xf32>
    %149 = arith.mulf %144, %146 : vector<8x32xf32>
    %150 = arith.addf %148, %149 : vector<8x32xf32>
    %151 = math.tanh %150 : vector<8x32xf32>
    %152 = arith.mulf %147, %151 : vector<8x32xf32>
    %c7_i32 = arith.constant 7 : i32
    %153 = arith.index_cast %c7_i32 : i32 to index
    %c0_34 = arith.constant 0 : index
    %c0_35 = arith.constant 0 : index
    %154 = vector.load %arg2[%153, %c0_34, %c0_35] : memref<8x8x128xf32, #tpu.memory_space<vmem>>, vector<1x8x128xf32>
    %155 = vector.shape_cast %154 : vector<1x8x128xf32> to vector<8x128xf32>
    %156 = arith.truncf %152 : vector<8x32xf32> to vector<8x32xbf16>
    %cst_36 = arith.constant dense<0.000000e+00> : vector<8x128xf32>
    %157 = tpu.matmul %156, %3, %cst_36 {dimension_numbers = #tpu.dot_dimension_numbers<[1], [0], [0], [1], [0, 0, 1, 1], [], []>} : vector<8x32xbf16>, vector<32x128xbf16>, vector<8x128xf32> -> vector<8x128xf32>
    %158 = arith.addf %155, %157 : vector<8x128xf32>
    %159 = arith.negf %158 : vector<8x128xf32>
    %160 = math.exp %159 : vector<8x128xf32>
    %cst_37 = arith.constant 1.000000e+00 : f32
    %161 = vector.broadcast %cst_37 : f32 to vector<8x128xf32>
    %162 = arith.addf %161, %160 : vector<8x128xf32>
    %163 = arith.divf %161, %162 : vector<8x128xf32>
    %164 = math.tanh %158 : vector<8x128xf32>
    %165 = vector.extract_strided_slice %163 {offsets = [0, 0], sizes = [8, 32], strides = [1, 1]} : vector<8x128xf32> to vector<8x32xf32>
    %166 = vector.extract_strided_slice %163 {offsets = [0, 32], sizes = [8, 32], strides = [1, 1]} : vector<8x128xf32> to vector<8x32xf32>
    %167 = vector.extract_strided_slice %164 {offsets = [0, 64], sizes = [8, 32], strides = [1, 1]} : vector<8x128xf32> to vector<8x32xf32>
    %168 = vector.extract_strided_slice %163 {offsets = [0, 96], sizes = [8, 32], strides = [1, 1]} : vector<8x128xf32> to vector<8x32xf32>
    %169 = arith.mulf %166, %150 : vector<8x32xf32>
    %170 = arith.mulf %165, %167 : vector<8x32xf32>
    %171 = arith.addf %169, %170 : vector<8x32xf32>
    %172 = math.tanh %171 : vector<8x32xf32>
    %173 = arith.mulf %168, %172 : vector<8x32xf32>
    %c8_i32 = arith.constant 8 : i32
    %c0_38 = arith.constant 0 : index
    %c0_39 = arith.constant 0 : index
    %174 = vector.load %arg5[%c0_38, %c0_39] : memref<8x32xf32, #tpu.memory_space<vmem>>, vector<8x32xf32>
    tpu.vector_store %arg5[%c0_38, %c0_39], %173 {strides = array<i32>} : memref<8x32xf32, #tpu.memory_space<vmem>>, vector<8x32xf32>,
    %c0_40 = arith.constant 0 : index
    %c0_41 = arith.constant 0 : index
    %175 = vector.load %arg6[%c0_40, %c0_41] : memref<8x32xf32, #tpu.memory_space<vmem>>, vector<8x32xf32>
    tpu.vector_store %arg6[%c0_40, %c0_41], %171 {strides = array<i32>} : memref<8x32xf32, #tpu.memory_space<vmem>>, vector<8x32xf32>,
    %c0_i32_42 = arith.constant 0 : i32
    %176 = arith.cmpi eq, %arg1, %c0_i32_42 : i32
    %177 = arith.extui %176 : i1 to i32
    %c0_i32_43 = arith.constant 0 : i32
    %178 = arith.cmpi ne, %177, %c0_i32_43 : i32
    scf.if %178 {
      %c0_44 = arith.constant 0 : index
      %c0_45 = arith.constant 0 : index
      %179 = vector.load %arg4[%c0_44, %c0_45] : memref<8x32xf32, #tpu.memory_space<vmem>>, vector<8x32xf32>
      tpu.vector_store %arg4[%c0_44, %c0_45], %173 {strides = array<i32>} : memref<8x32xf32, #tpu.memory_space<vmem>>, vector<8x32xf32>,
    } else {
    }
    return
  }
  func.func @transform_0(%arg0: i32, %arg1: i32) -> (i32, i32, i32) {
    %c0_i32 = arith.constant 0 : i32
    %c0_i32_0 = arith.constant 0 : i32
    return %arg1, %arg0, %c0_i32 : i32, i32, i32
  }
  func.func @transform_1(%arg0: i32, %arg1: i32) -> (i32, i32) {
    %c0_i32 = arith.constant 0 : i32
    %c0_i32_0 = arith.constant 0 : i32
    %c0_i32_1 = arith.constant 0 : i32
    return %c0_i32, %c0_i32_0 : i32, i32
  }
  func.func @transform_2(%arg0: i32, %arg1: i32) -> (i32, i32) {
    %c0_i32 = arith.constant 0 : i32
    %c0_i32_0 = arith.constant 0 : i32
    return %arg0, %c0_i32 : i32, i32
  }
}

</mosaic_0001>

<bundles_post_ra>
// kernel: lstm_classifier_forward.1
= control target key start
LH: loop header
LB: loop body
LE: loop exit
PB: predicated region body
PF: predicated region fallthrough
CT: control target
= control target key end

     0   :  { %vm16_vm0 = vcmask 261120   ;;  %v637_v1 = vmov 0.0   ;;  %s638_s14 = smov 64   ;;  %s639_s15 = smov 32   ;;  %s735_s1 = inlined_call_operand.vmem [shape: bf16[32,128], index: 1, kind: input, shape index: {}]   ;;  %s736_s0 = inlined_call_operand.vmem [shape: f32[8,8,128], index: 0, kind: input, shape index: {}]   ;;  %s737_s2 = inlined_call_operand.vmem [shape: f32[8,32], index: 2, kind: output, shape index: {}]  }
   0x1   :  { %v568_v0 = vld [vmem:[%s735_s1 + $0x8] sm:$0xff]  ;;  %17 = vst.msk [vmem:[#allocation2] sm:$0xff] %vm16_vm0, %v637_v1  ;;  %v567_v2 = vld [vmem:[%s735_s1] sm:$0xff]  ;;  %v549_v63 = vld [vmem:[%s736_s0 + $0x10] sm:$0xff] }
   0x2   :  { %18 = vst.msk [vmem:[#allocation3] sm:$0xff] %vm16_vm0, %v637_v1  ;;  %49 = vmatpush.bf16.msra.mxu0 %v568_v0  ;;  %113 = vmatpush.bf16.msra.mxu1 %v568_v0  ;;  %v25_v5 = vld [vmem:[%s736_s0] sm:$0xff]  ;;  %v546_v35 = vld [vmem:[%s736_s0 + $0x8] sm:$0xff] }
   0x3   :  { %173 = vmatpush.bf16.msra.mxu2 %v568_v0  ;;  %233 = vmatpush.bf16.msra.mxu3 %v568_v0 }
   0x6   :  { %50 = vmatpush.bf16.msra.mxu0 %v567_v2  ;;  %114 = vmatpush.bf16.msra.mxu1 %v567_v2 }
   0x7   :  { %174 = vmatpush.bf16.msra.mxu2 %v567_v2  ;;  %234 = vmatpush.bf16.msra.mxu3 %v567_v2 }
   0x8   :  { %v23_v3 = vld [vmem:[#allocation2] sm:$0xff] }
   0x9   :  { %v26_v4 = vpack.c.bf16 %v23_v3, %v23_v3  ;;  %v24_v10 = vld [vmem:[#allocation3] sm:$0xff] }
   0xa   :  { %293 = vmatpush.bf16.msrb.mxu0 %v568_v0  ;;  %353 = vmatpush.bf16.msrb.mxu1 %v568_v0 }
   0xb   :  { %413 = vmatpush.bf16.msrb.mxu2 %v568_v0  ;;  %473 = vmatpush.bf16.msrb.mxu3 %v568_v0 }
   0xc   :  { %544 = vmatmul.msk.bf16.vlgmr.msra.gmra.mxu0 %vm16_vm0, %v26_v4 }
   0xe   :  { %294 = vmatpush.bf16.msrb.mxu0 %v567_v2  ;;  %354 = vmatpush.bf16.msrb.mxu1 %v567_v2 }
   0xf   :  { %414 = vmatpush.bf16.msrb.mxu2 %v567_v2  ;;  %474 = vmatpush.bf16.msrb.mxu3 %v567_v2 }
  0x89   :  { %v52_v6 = vpop.f32.mrf.mxu0 }
  0x8a   :  { %v56_v7 = vadd.f32 %v52_v6, %v25_v5 }
  0x8c   :  { %573 = vtanh.f32 %v56_v7  ;;  %v545_v11 = vmul.f32 -1.442695, %v56_v7 }
  0x8e   :  { %575 = vpow2.f32 %v545_v11 }
  0x91   :  { %v54_v8 = vpop.f32.mrf.mxu0 }
  0x92   :  { %v574_v9 = vpop.eup %573 }
  0x93   :  { %83 = vrot.lane.b32.xlu0 %v574_v9, %s638_s14 }
  0x94   :  { %v576_v12 = vpop.eup %575 }
  0x95   :  { %v60_v13 = vadd.f32 1.0, %v576_v12 }
  0x97   :  { %577 = vrcp.f32 %v60_v13  ;;  %v72_v19 = vand.u32 2147483648, %v60_v13  ;;  %vm66_vm2 = vweird.f32 %v60_v13  ;;  %v70_v20 = vand.u32 2147483647, %v60_v13 }
  0x99   :  { %v73_v22 = vor.u32 1.1754944e-38, %v72_v19  ;;  %vm71_vm4 = vcmp.eq.f32.partialorder %v70_v20, 8.507059e+37 }
  0x9b   :  { %78 = vrot.lane.b32.xlu0 %v24_v10, %s639_s15 }
  0x9d   :  { %v578_v14 = vpop.eup %577 }
  0x9e   :  { %v62_v15 = vmul.f32 %v578_v14, %v60_v13  ;;  %vm67_vm1 = vweird.f32 %v578_v14 }
  0x9f   :  { %vm68_vm3 = vmor %vm66_vm2, %vm67_vm1 }
  0xa0   :  { %v63_v16 = vsub.f32 1.0, %v62_v15 }
  0xa2   :  { %v64_v17 = vmul.f32 %v578_v14, %v63_v16 }
  0xa4   :  { %v65_v18 = vadd.f32 %v578_v14, %v64_v17 }
  0xa6   :  { %v69_v21 = vsel %vm68_vm3, %v578_v14, %v65_v18 }
  0xa7   :  { %v74_v24 = vsel %vm71_vm4, %v73_v22, %v69_v21 }
 0x105   :  { %v84_v23 = vpop.permute.xlu0 %83 }
 0x106   :  { %v86_v25 = vmul.f32 %v84_v23, %v74_v24 }
 0x108   :  { %88 = vrot.lane.b32.xlu1 %v86_v25, %s639_s15 }
 0x10d   :  { %v79_v26 = vpop.permute.xlu0 %78 }
 0x10e   :  { %v81_v27 = vmul.f32 %v79_v26, %v74_v24 }
 0x17a   :  { %v89_v28 = vpop.permute.xlu1 %88 }
 0x17b   :  { %v91_v29 = vadd.f32 %v89_v28, %v81_v27  ;;  %v552_v27 = vld [vmem:[%s736_s0 + $0x18] sm:$0xff] }
 0x17d   :  { %579 = vtanh.f32 %v91_v29 }
 0x183   :  { %v580_v30 = vpop.eup %579 }
 0x184   :  { %94 = vrot.lane.b32.xlu1 %v580_v30, %s638_s14 }
 0x1f6   :  { %v95_v31 = vpop.permute.xlu1 %94 }
 0x1f7   :  { %v97_v32 = vmul.f32 %v95_v31, %v74_v24 }
 0x1f9   :  { %v100_v33 = vpack.c.bf16 %v97_v32, %v97_v32 }
 0x1fb   :  { %102 = vrot.lane.b32.xlu2 %v100_v33, %s639_s15 }
 0x255   :  { %v103_v34 = vpop.permute.xlu2 %102 }
 0x256   :  { %547 = vmatmul.msk.bf16.vlgmr.msra.gmra.mxu1 %vm16_vm0, %v103_v34 }
 0x2d3   :  { %v116_v36 = vpop.f32.mrf.mxu1 }
 0x2d4   :  { %v120_v37 = vadd.f32 %v546_v35, %v116_v36 }
 0x2d6   :  { %581 = vtanh.f32 %v120_v37  ;;  %v548_v40 = vmul.f32 -1.442695, %v120_v37 }
 0x2d8   :  { %583 = vpow2.f32 %v548_v40 }
 0x2db   :  { %v118_v38 = vpop.f32.mrf.mxu1 }
 0x2dc   :  { %v582_v39 = vpop.eup %581 }
 0x2dd   :  { %143 = vrot.lane.b32.xlu2 %v582_v39, %s638_s14 }
 0x2de   :  { %v584_v41 = vpop.eup %583 }
 0x2df   :  { %v124_v42 = vadd.f32 1.0, %v584_v41 }
 0x2e1   :  { %585 = vrcp.f32 %v124_v42  ;;  %v136_v48 = vand.u32 2147483648, %v124_v42  ;;  %vm130_vm6 = vweird.f32 %v124_v42  ;;  %v134_v49 = vand.u32 2147483647, %v124_v42 }
 0x2e3   :  { %v137_v51 = vor.u32 1.1754944e-38, %v136_v48  ;;  %vm135_vm8 = vcmp.eq.f32.partialorder %v134_v49, 8.507059e+37 }
 0x2e7   :  { %v586_v43 = vpop.eup %585 }
 0x2e8   :  { %v126_v44 = vmul.f32 %v586_v43, %v124_v42  ;;  %vm131_vm5 = vweird.f32 %v586_v43 }
 0x2e9   :  { %vm132_vm7 = vmor %vm130_vm6, %vm131_vm5 }
 0x2ea   :  { %v127_v45 = vsub.f32 1.0, %v126_v44 }
 0x2ec   :  { %v128_v46 = vmul.f32 %v586_v43, %v127_v45 }
 0x2ee   :  { %v129_v47 = vadd.f32 %v586_v43, %v128_v46 }
 0x2f0   :  { %v133_v50 = vsel %vm132_vm7, %v586_v43, %v129_v47 }
 0x2f1   :  { %v138_v53 = vsel %vm135_vm8, %v137_v51, %v133_v50 }
 0x2f2   :  { %v141_v55 = vmul.f32 %v138_v53, %v91_v29 }
 0x337   :  { %v144_v52 = vpop.permute.xlu2 %143 }
 0x338   :  { %v146_v54 = vmul.f32 %v144_v52, %v138_v53 }
 0x33a   :  { %148 = vrot.lane.b32.xlu0 %v146_v54, %s639_s15 }
 0x3ac   :  { %v149_v56 = vpop.permute.xlu0 %148 }
 0x3ad   :  { %v151_v57 = vadd.f32 %v149_v56, %v141_v55  ;;  %v555_v55 = vld [vmem:[%s736_s0 + $0x20] sm:$0xff] }
 0x3af   :  { %587 = vtanh.f32 %v151_v57 }
 0x3b5   :  { %v588_v58 = vpop.eup %587 }
 0x3b6   :  { %154 = vrot.lane.b32.xlu1 %v588_v58, %s638_s14 }
 0x428   :  { %v155_v59 = vpop.permute.xlu1 %154 }
 0x429   :  { %v157_v60 = vmul.f32 %v155_v59, %v138_v53 }
 0x42b   :  { %v160_v61 = vpack.c.bf16 %v157_v60, %v157_v60 }
 0x42d   :  { %162 = vrot.lane.b32.xlu2 %v160_v61, %s639_s15 }
 0x487   :  { %v163_v62 = vpop.permute.xlu2 %162 }
 0x488   :  { %550 = vmatmul.msk.bf16.vlgmr.msra.gmra.mxu2 %vm16_vm0, %v163_v62 }
 0x50b   :  { %v176_v0 = vpop.f32.mrf.mxu2 }
 0x50c   :  { %v180_v1 = vadd.f32 %v549_v63, %v176_v0 }
 0x50e   :  { %589 = vtanh.f32 %v180_v1  ;;  %v551_v4 = vmul.f32 -1.442695, %v180_v1 }
 0x510   :  { %591 = vpow2.f32 %v551_v4 }
 0x513   :  { %v178_v2 = vpop.f32.mrf.mxu2 }
 0x514   :  { %v590_v3 = vpop.eup %589 }
 0x515   :  { %203 = vrot.lane.b32.xlu0 %v590_v3, %s638_s14 }
 0x516   :  { %v592_v5 = vpop.eup %591 }
 0x517   :  { %v184_v6 = vadd.f32 1.0, %v592_v5 }
 0x519   :  { %593 = vrcp.f32 %v184_v6  ;;  %v196_v12 = vand.u32 2147483648, %v184_v6  ;;  %vm190_vm10 = vweird.f32 %v184_v6  ;;  %v194_v13 = vand.u32 2147483647, %v184_v6 }
 0x51b   :  { %v197_v15 = vor.u32 1.1754944e-38, %v196_v12  ;;  %vm195_vm12 = vcmp.eq.f32.partialorder %v194_v13, 8.507059e+37 }
 0x51f   :  { %v594_v7 = vpop.eup %593 }
 0x520   :  { %v186_v8 = vmul.f32 %v594_v7, %v184_v6  ;;  %vm191_vm9 = vweird.f32 %v594_v7 }
 0x521   :  { %vm192_vm11 = vmor %vm190_vm10, %vm191_vm9 }
 0x522   :  { %v187_v9 = vsub.f32 1.0, %v186_v8 }
 0x524   :  { %v188_v10 = vmul.f32 %v594_v7, %v187_v9 }
 0x526   :  { %v189_v11 = vadd.f32 %v594_v7, %v188_v10 }
 0x528   :  { %v193_v14 = vsel %vm192_vm11, %v594_v7, %v189_v11 }
 0x529   :  { %v198_v17 = vsel %vm195_vm12, %v197_v15, %v193_v14 }
 0x52a   :  { %v201_v19 = vmul.f32 %v198_v17, %v151_v57 }
 0x587   :  { %v204_v16 = vpop.permute.xlu0 %203 }
 0x588   :  { %v206_v18 = vmul.f32 %v204_v16, %v198_v17 }
 0x58a   :  { %208 = vrot.lane.b32.xlu1 %v206_v18, %s639_s15 }
 0x5fc   :  { %v209_v20 = vpop.permute.xlu1 %208 }
 0x5fd   :  { %v211_v21 = vadd.f32 %v209_v20, %v201_v19  ;;  %v558_v19 = vld [vmem:[%s736_s0 + $0x28] sm:$0xff] }
 0x5ff   :  { %595 = vtanh.f32 %v211_v21 }
 0x605   :  { %v596_v22 = vpop.eup %595 }
 0x606   :  { %214 = vrot.lane.b32.xlu2 %v596_v22, %s638_s14 }
 0x660   :  { %v215_v23 = vpop.permute.xlu2 %214 }
 0x661   :  { %v217_v24 = vmul.f32 %v215_v23, %v198_v17 }
 0x663   :  { %v220_v25 = vpack.c.bf16 %v217_v24, %v217_v24 }
 0x665   :  { %222 = vrot.lane.b32.xlu0 %v220_v25, %s639_s15 }
 0x6d7   :  { %v223_v26 = vpop.permute.xlu0 %222 }
 0x6d8   :  { %553 = vmatmul.msk.bf16.vlgmr.msra.gmra.mxu3 %vm16_vm0, %v223_v26 }
 0x75b   :  { %v236_v28 = vpop.f32.mrf.mxu3 }
 0x75c   :  { %v240_v29 = vadd.f32 %v552_v27, %v236_v28 }
 0x75e   :  { %597 = vtanh.f32 %v240_v29  ;;  %v554_v32 = vmul.f32 -1.442695, %v240_v29 }
 0x760   :  { %599 = vpow2.f32 %v554_v32 }
 0x763   :  { %v238_v30 = vpop.f32.mrf.mxu3 }
 0x764   :  { %v598_v31 = vpop.eup %597 }
 0x765   :  { %263 = vrot.lane.b32.xlu1 %v598_v31, %s638_s14 }
 0x766   :  { %v600_v33 = vpop.eup %599 }
 0x767   :  { %v244_v34 = vadd.f32 1.0, %v600_v33 }
 0x769   :  { %601 = vrcp.f32 %v244_v34  ;;  %v256_v40 = vand.u32 2147483648, %v244_v34  ;;  %vm250_vm14 = vweird.f32 %v244_v34  ;;  %v254_v41 = vand.u32 2147483647, %v244_v34 }
 0x76b   :  { %v257_v43 = vor.u32 1.1754944e-38, %v256_v40  ;;  %vm255_vm1 = vcmp.eq.f32.partialorder %v254_v41, 8.507059e+37 }
 0x76f   :  { %v602_v35 = vpop.eup %601 }
 0x770   :  { %v246_v36 = vmul.f32 %v602_v35, %v244_v34  ;;  %vm251_vm13 = vweird.f32 %v602_v35 }
 0x771   :  { %vm252_vm15 = vmor %vm250_vm14, %vm251_vm13 }
 0x772   :  { %v247_v37 = vsub.f32 1.0, %v246_v36 }
 0x774   :  { %v248_v38 = vmul.f32 %v602_v35, %v247_v37 }
 0x776   :  { %v249_v39 = vadd.f32 %v602_v35, %v248_v38 }
 0x778   :  { %v253_v42 = vsel %vm252_vm15, %v602_v35, %v249_v39 }
 0x779   :  { %v258_v45 = vsel %vm255_vm1, %v257_v43, %v253_v42 }
 0x77a   :  { %v261_v47 = vmul.f32 %v258_v45, %v211_v21 }
 0x7d7   :  { %v264_v44 = vpop.permute.xlu1 %263 }
 0x7d8   :  { %v266_v46 = vmul.f32 %v264_v44, %v258_v45 }
 0x7da   :  { %268 = vrot.lane.b32.xlu2 %v266_v46, %s639_s15 }
 0x834   :  { %v269_v48 = vpop.permute.xlu2 %268 }
 0x835   :  { %v271_v49 = vadd.f32 %v269_v48, %v261_v47  ;;  %v561_v47 = vld [vmem:[%s736_s0 + $0x30] sm:$0xff] }
 0x837   :  { %603 = vtanh.f32 %v271_v49 }
 0x83d   :  { %v604_v50 = vpop.eup %603 }
 0x83e   :  { %274 = vrot.lane.b32.xlu0 %v604_v50, %s638_s14 }
 0x8b0   :  { %v275_v51 = vpop.permute.xlu0 %274 }
 0x8b1   :  { %v277_v52 = vmul.f32 %v275_v51, %v258_v45 }
 0x8b3   :  { %v280_v53 = vpack.c.bf16 %v277_v52, %v277_v52 }
 0x8b5   :  { %282 = vrot.lane.b32.xlu1 %v280_v53, %s639_s15 }
 0x927   :  { %v283_v54 = vpop.permute.xlu1 %282 }
 0x928   :  { %556 = vmatmul.msk.bf16.vlgmr.msrb.gmra.mxu0 %vm16_vm0, %v283_v54 }
 0x9a5   :  { %v296_v56 = vpop.f32.mrf.mxu0 }
 0x9a6   :  { %v300_v57 = vadd.f32 %v555_v55, %v296_v56 }
 0x9a8   :  { %605 = vtanh.f32 %v300_v57  ;;  %v557_v60 = vmul.f32 -1.442695, %v300_v57 }
 0x9aa   :  { %607 = vpow2.f32 %v557_v60 }
 0x9ad   :  { %v298_v58 = vpop.f32.mrf.mxu0 }
 0x9ae   :  { %v606_v59 = vpop.eup %605 }
 0x9af   :  { %323 = vrot.lane.b32.xlu2 %v606_v59, %s638_s14 }
 0x9b0   :  { %v608_v61 = vpop.eup %607 }
 0x9b1   :  { %v304_v62 = vadd.f32 1.0, %v608_v61 }
 0x9b3   :  { %609 = vrcp.f32 %v304_v62  ;;  %v316_v4 = vand.u32 2147483648, %v304_v62  ;;  %vm310_vm3 = vweird.f32 %v304_v62  ;;  %v314_v5 = vand.u32 2147483647, %v304_v62 }
 0x9b5   :  { %v317_v7 = vor.u32 1.1754944e-38, %v316_v4  ;;  %vm315_vm5 = vcmp.eq.f32.partialorder %v314_v5, 8.507059e+37 }
 0x9b9   :  { %v610_v63 = vpop.eup %609 }
 0x9ba   :  { %v306_v0 = vmul.f32 %v610_v63, %v304_v62  ;;  %vm311_vm2 = vweird.f32 %v610_v63 }
 0x9bb   :  { %vm312_vm4 = vmor %vm310_vm3, %vm311_vm2 }
 0x9bc   :  { %v307_v1 = vsub.f32 1.0, %v306_v0 }
 0x9be   :  { %v308_v2 = vmul.f32 %v610_v63, %v307_v1 }
 0x9c0   :  { %v309_v3 = vadd.f32 %v610_v63, %v308_v2 }
 0x9c2   :  { %v313_v6 = vsel %vm312_vm4, %v610_v63, %v309_v3 }
 0x9c3   :  { %v318_v9 = vsel %vm315_vm5, %v317_v7, %v313_v6 }
 0x9c4   :  { %v321_v11 = vmul.f32 %v318_v9, %v271_v49 }
 0xa09   :  { %v324_v8 = vpop.permute.xlu2 %323 }
 0xa0a   :  { %v326_v10 = vmul.f32 %v324_v8, %v318_v9 }
 0xa0c   :  { %328 = vrot.lane.b32.xlu0 %v326_v10, %s639_s15 }
 0xa7e   :  { %v329_v12 = vpop.permute.xlu0 %328 }
 0xa7f   :  { %v331_v13 = vadd.f32 %v329_v12, %v321_v11  ;;  %v564_v11 = vld [vmem:[%s736_s0 + $0x38] sm:$0xff]  ;;  %s640_s0 = smov 96  }
 0xa81   :  { %611 = vtanh.f32 %v331_v13 }
 0xa87   :  { %v612_v14 = vpop.eup %611 }
 0xa88   :  { %334 = vrot.lane.b32.xlu1 %v612_v14, %s638_s14 }
 0xafa   :  { %v335_v15 = vpop.permute.xlu1 %334 }
 0xafb   :  { %v337_v16 = vmul.f32 %v335_v15, %v318_v9 }
 0xafd   :  { %v340_v17 = vpack.c.bf16 %v337_v16, %v337_v16 }
 0xaff   :  { %342 = vrot.lane.b32.xlu2 %v340_v17, %s639_s15 }
 0xb59   :  { %v343_v18 = vpop.permute.xlu2 %342 }
 0xb5a   :  { %559 = vmatmul.msk.bf16.vlgmr.msrb.gmra.mxu1 %vm16_vm0, %v343_v18 }
 0xbd7   :  { %v356_v20 = vpop.f32.mrf.mxu1 }
 0xbd8   :  { %v360_v21 = vadd.f32 %v558_v19, %v356_v20 }
 0xbda   :  { %613 = vtanh.f32 %v360_v21  ;;  %v560_v24 = vmul.f32 -1.442695, %v360_v21 }
 0xbdc   :  { %615 = vpow2.f32 %v560_v24 }
 0xbdf   :  { %v358_v22 = vpop.f32.mrf.mxu1 }
 0xbe0   :  { %v614_v23 = vpop.eup %613 }
 0xbe1   :  { %383 = vrot.lane.b32.xlu0 %v614_v23, %s638_s14 }
 0xbe2   :  { %v616_v25 = vpop.eup %615 }
 0xbe3   :  { %v364_v26 = vadd.f32 1.0, %v616_v25 }
 0xbe5   :  { %617 = vrcp.f32 %v364_v26  ;;  %v376_v32 = vand.u32 2147483648, %v364_v26  ;;  %vm370_vm7 = vweird.f32 %v364_v26  ;;  %v374_v33 = vand.u32 2147483647, %v364_v26 }
 0xbe7   :  { %v377_v35 = vor.u32 1.1754944e-38, %v376_v32  ;;  %vm375_vm9 = vcmp.eq.f32.partialorder %v374_v33, 8.507059e+37 }
 0xbeb   :  { %v618_v27 = vpop.eup %617 }
 0xbec   :  { %v366_v28 = vmul.f32 %v618_v27, %v364_v26  ;;  %vm371_vm6 = vweird.f32 %v618_v27 }
 0xbed   :  { %vm372_vm8 = vmor %vm370_vm7, %vm371_vm6 }
 0xbee   :  { %v367_v29 = vsub.f32 1.0, %v366_v28 }
 0xbf0   :  { %v368_v30 = vmul.f32 %v618_v27, %v367_v29 }
 0xbf2   :  { %v369_v31 = vadd.f32 %v618_v27, %v368_v30 }
 0xbf4   :  { %v373_v34 = vsel %vm372_vm8, %v618_v27, %v369_v31 }
 0xbf5   :  { %v378_v37 = vsel %vm375_vm9, %v377_v35, %v373_v34 }
 0xbf6   :  { %v381_v39 = vmul.f32 %v378_v37, %v331_v13 }
 0xc53   :  { %v384_v36 = vpop.permute.xlu0 %383 }
 0xc54   :  { %v386_v38 = vmul.f32 %v384_v36, %v378_v37 }
 0xc56   :  { %388 = vrot.lane.b32.xlu1 %v386_v38, %s639_s15 }
 0xcc8   :  { %v389_v40 = vpop.permute.xlu1 %388 }
 0xcc9   :  { %v391_v41 = vadd.f32 %v389_v40, %v381_v39 }
 0xccb   :  { %619 = vtanh.f32 %v391_v41 }
 0xcd1   :  { %v620_v42 = vpop.eup %619 }
 0xcd2   :  { %394 = vrot.lane.b32.xlu2 %v620_v42, %s638_s14 }
 0xd2c   :  { %v395_v43 = vpop.permute.xlu2 %394 }
 0xd2d   :  { %v397_v44 = vmul.f32 %v395_v43, %v378_v37 }
 0xd2f   :  { %v400_v45 = vpack.c.bf16 %v397_v44, %v397_v44 }
 0xd31   :  { %402 = vrot.lane.b32.xlu0 %v400_v45, %s639_s15 }
 0xda3   :  { %v403_v46 = vpop.permute.xlu0 %402 }
 0xda4   :  { %562 = vmatmul.msk.bf16.vlgmr.msrb.gmra.mxu2 %vm16_vm0, %v403_v46 }
 0xe27   :  { %v416_v48 = vpop.f32.mrf.mxu2 }
 0xe28   :  { %v420_v49 = vadd.f32 %v561_v47, %v416_v48 }
 0xe2a   :  { %621 = vtanh.f32 %v420_v49  ;;  %v563_v52 = vmul.f32 -1.442695, %v420_v49 }
 0xe2c   :  { %623 = vpow2.f32 %v563_v52 }
 0xe2f   :  { %v418_v50 = vpop.f32.mrf.mxu2 }
 0xe30   :  { %v622_v51 = vpop.eup %621 }
 0xe31   :  { %443 = vrot.lane.b32.xlu1 %v622_v51, %s638_s14 }
 0xe32   :  { %v624_v53 = vpop.eup %623 }
 0xe33   :  { %v424_v54 = vadd.f32 1.0, %v624_v53 }
 0xe35   :  { %625 = vrcp.f32 %v424_v54  ;;  %v436_v60 = vand.u32 2147483648, %v424_v54  ;;  %vm430_vm11 = vweird.f32 %v424_v54  ;;  %v434_v61 = vand.u32 2147483647, %v424_v54 }
 0xe37   :  { %v437_v63 = vor.u32 1.1754944e-38, %v436_v60  ;;  %vm435_vm13 = vcmp.eq.f32.partialorder %v434_v61, 8.507059e+37 }
 0xe3b   :  { %v626_v55 = vpop.eup %625 }
 0xe3c   :  { %v426_v56 = vmul.f32 %v626_v55, %v424_v54  ;;  %vm431_vm10 = vweird.f32 %v626_v55 }
 0xe3d   :  { %vm432_vm12 = vmor %vm430_vm11, %vm431_vm10 }
 0xe3e   :  { %v427_v57 = vsub.f32 1.0, %v426_v56 }
 0xe40   :  { %v428_v58 = vmul.f32 %v626_v55, %v427_v57 }
 0xe42   :  { %v429_v59 = vadd.f32 %v626_v55, %v428_v58 }
 0xe44   :  { %v433_v62 = vsel %vm432_vm12, %v626_v55, %v429_v59 }
 0xe45   :  { %v438_v1 = vsel %vm435_vm13, %v437_v63, %v433_v62 }
 0xe46   :  { %v441_v3 = vmul.f32 %v438_v1, %v391_v41 }
 0xea3   :  { %v444_v0 = vpop.permute.xlu1 %443 }
 0xea4   :  { %v446_v2 = vmul.f32 %v444_v0, %v438_v1 }
 0xea6   :  { %448 = vrot.lane.b32.xlu2 %v446_v2, %s639_s15 }
 0xf00   :  { %v449_v4 = vpop.permute.xlu2 %448 }
 0xf01   :  { %v451_v5 = vadd.f32 %v449_v4, %v441_v3 }
 0xf03   :  { %627 = vtanh.f32 %v451_v5 }
 0xf09   :  { %v628_v6 = vpop.eup %627 }
 0xf0a   :  { %454 = vrot.lane.b32.xlu0 %v628_v6, %s638_s14 }
 0xf7c   :  { %v455_v7 = vpop.permute.xlu0 %454 }
 0xf7d   :  { %v457_v8 = vmul.f32 %v455_v7, %v438_v1 }
 0xf7f   :  { %v460_v9 = vpack.c.bf16 %v457_v8, %v457_v8 }
 0xf81   :  { %462 = vrot.lane.b32.xlu1 %v460_v9, %s639_s15 }
 0xff3   :  { %v463_v10 = vpop.permute.xlu1 %462 }
 0xff4   :  { %565 = vmatmul.msk.bf16.vlgmr.msrb.gmra.mxu3 %vm16_vm0, %v463_v10 }
0x1077   :  { %v476_v12 = vpop.f32.mrf.mxu3 }
0x1078   :  { %v480_v13 = vadd.f32 %v564_v11, %v476_v12 }
0x107a   :  { %629 = vtanh.f32 %v480_v13  ;;  %v566_v16 = vmul.f32 -1.442695, %v480_v13 }
0x107c   :  { %631 = vpow2.f32 %v566_v16 }
0x107f   :  { %v478_v14 = vpop.f32.mrf.mxu3 }
0x1080   :  { %v630_v15 = vpop.eup %629 }
0x1081   :  { %503 = vrot.lane.b32.xlu2 %v630_v15, %s638_s14 }
0x1082   :  { %v632_v17 = vpop.eup %631 }
0x1083   :  { %v484_v18 = vadd.f32 1.0, %v632_v17 }
0x1085   :  { %633 = vrcp.f32 %v484_v18  ;;  %v496_v24 = vand.u32 2147483648, %v484_v18  ;;  %vm490_vm15 = vweird.f32 %v484_v18  ;;  %v494_v25 = vand.u32 2147483647, %v484_v18 }
0x1087   :  { %v497_v27 = vor.u32 1.1754944e-38, %v496_v24  ;;  %vm495_vm2 = vcmp.eq.f32.partialorder %v494_v25, 8.507059e+37 }
0x108b   :  { %v634_v19 = vpop.eup %633 }
0x108c   :  { %v486_v20 = vmul.f32 %v634_v19, %v484_v18  ;;  %vm491_vm14 = vweird.f32 %v634_v19 }
0x108d   :  { %vm492_vm1 = vmor %vm490_vm15, %vm491_vm14 }
0x108e   :  { %v487_v21 = vsub.f32 1.0, %v486_v20 }
0x1090   :  { %v488_v22 = vmul.f32 %v634_v19, %v487_v21 }
0x1092   :  { %v489_v23 = vadd.f32 %v634_v19, %v488_v22 }
0x1094   :  { %v493_v26 = vsel %vm492_vm1, %v634_v19, %v489_v23 }
0x1095   :  { %v498_v29 = vsel %vm495_vm2, %v497_v27, %v493_v26 }
0x1096   :  { %v501_v31 = vmul.f32 %v498_v29, %v451_v5 }
0x10db   :  { %v504_v28 = vpop.permute.xlu2 %503 }
0x10dc   :  { %v506_v30 = vmul.f32 %v504_v28, %v498_v29 }
0x10de   :  { %508 = vrot.lane.b32.xlu0 %v506_v30, %s639_s15 }
0x1150   :  { %v509_v32 = vpop.permute.xlu0 %508 }
0x1151   :  { %v511_v33 = vadd.f32 %v509_v32, %v501_v31 }
0x1153   :  { %635 = vtanh.f32 %v511_v33  ;;  %524 = vrot.lane.b32.xlu0 %v511_v33, %s640_s0 }
0x1159   :  { %v636_v34 = vpop.eup %635 }
0x115a   :  { %514 = vrot.lane.b32.xlu1 %v636_v34, %s638_s14 }
0x11c5   :  { %v525_v35 = vpop.permute.xlu0 %524 }
0x11c6   :  { %527 = vst.msk [vmem:[#allocation3] sm:$0xff] %vm16_vm0, %v525_v35 }
0x11cc   :  { %v515_v36 = vpop.permute.xlu1 %514 }
0x11cd   :  { %v517_v37 = vmul.f32 %v515_v36, %v498_v29 }
0x11cf   :  { %519 = vrot.lane.b32.xlu2 %v517_v37, %s639_s15 }
0x1229   :  { %v520_v38 = vpop.permute.xlu2 %519 }
0x122a   :  { %522 = vst.msk [vmem:[#allocation2] sm:$0xff] %vm16_vm0, %v520_v38 }
0x122b   :  { %531 = vst.msk [vmem:[%s737_s2] sm:$0xff] %vm16_vm0, %v520_v38 }

</bundles_post_ra>
